<compile_context>
chip_gen: v5e
topology: v5e:2x2
jax: 0.10.0
libtpu: 0.0.40
codegen_flags: <defaults>
</compile_context>

<pallas_src>
import functools

import jax
import jax.numpy as jnp
from jax.experimental import pallas as pl
from jax.experimental.pallas import tpu as pltpu

_HALO = 128  # lane-aligned look-ahead window; requires ceil(K/stride) <= 128


# ----------------------------------------------------------------------------
# Filter / weight construction (parameter setup == glue, plain JAX)
# ----------------------------------------------------------------------------
def hilbert_transforms_of_filters(filters):
    """JAX port of compute_Hilbert_transforms_of_filters (torch >= 1.7 branch)."""
    k = filters.shape[1]
    ft = jnp.fft.rfft(filters, n=k, axis=1, norm="ortho")
    # torch: view_as_complex(stack(ft.imag, -ft.real)) == -1j * ft
    hft = jnp.fft.irfft(-1j * ft, n=k, axis=1, norm="ortho")
    return hft.reshape(filters.shape).astype(filters.dtype)


def fir_weights(filters, in_channels, out_channels, use_hilbert_transforms):
    """weights(): (out_channels, in_channels, K) for a non-transposed SFI conv."""
    if use_hilbert_transforms:
        filters = jnp.concatenate(
            (filters, hilbert_transforms_of_filters(filters)), axis=0
        )
    return filters.reshape(out_channels, in_channels, -1)


# ----------------------------------------------------------------------------
# Pallas stride-1 conv1d kernel (the hot path)
# ----------------------------------------------------------------------------
def _fir_conv1d_s1_kernel(x_ref, xh_ref, w_ref, o_ref, *, k_taps, l_tile):
    # x_ref : (1, C, L_TILE)        main tile of the (padded) input
    # xh_ref: (1, C, _HALO)         the next 128 samples (halo)
    # w_ref : (C_out, K*C)          flattened weights, row-major (tap, channel)
    # o_ref : (1, C_out, L_TILE)    lane-dense output tile
    x_win = jnp.concatenate([x_ref[0], xh_ref[0]], axis=-1)      # (C, L_TILE+128)
    # im2col-style patch matrix: rows ordered q*C + c  ->  one fat MXU matmul.
    patches = jnp.concatenate(
        [x_win[:, q:q + l_tile] for q in range(k_taps)], axis=0)  # (K*C, L_TILE)
    acc = jnp.dot(w_ref[...], patches, preferred_element_type=jnp.float32)
    o_ref[0] = acc.astype(o_ref.dtype)


def _conv1d_stride1_pallas(x_pad, w_flat, *, k_taps, l_tile, n_l_tiles, out_dtype):
    """stride-1 conv of x_pad (N, C, n_l_tiles*l_tile + 128) with w_flat (C_out, K*C)."""
    n, c, l_x = x_pad.shape
    c_out = w_flat.shape[0]
    assert l_x == n_l_tiles * l_tile + _HALO
    assert l_tile % _HALO == 0

    kernel = functools.partial(_fir_conv1d_s1_kernel, k_taps=k_taps, l_tile=l_tile)
    halo_blocks_per_tile = l_tile // _HALO

    return pl.pallas_call(
        kernel,
        out_shape=jax.ShapeDtypeStruct((n, c_out, n_l_tiles * l_tile), out_dtype),
        grid=(n, n_l_tiles),
        in_specs=[
            # main L_TILE-wide tile
            pl.BlockSpec((1, c, l_tile), lambda b, j: (b, 0, j)),
            # 128-wide halo starting right after the main tile (same array, 2nd view)
            pl.BlockSpec((1, c, _HALO),
                         lambda b, j: (b, 0, (j + 1) * halo_blocks_per_tile)),
            # small weight block, identical index every step -> stays resident
            pl.BlockSpec((c_out, k_taps * c), lambda b, j: (0, 0)),
        ],
        out_specs=pl.BlockSpec((1, c_out, l_tile), lambda b, j: (b, 0, j)),
        compiler_params=pltpu.CompilerParams(
            dimension_semantics=("parallel", "parallel"),
            vmem_limit_bytes=32 * 1024 * 1024,
        ),
    )(x_pad, x_pad, w_flat)


# ----------------------------------------------------------------------------
# Public wrapper: F.conv1d(x, weights, stride, padding) semantics
# ----------------------------------------------------------------------------
def _round_up(x, m):
    return ((x + m - 1) // m) * m


def sfi_conv1d(x, weights, *, stride, padding, max_l_tile=1024):
    """conv1d(x NCL, weights OIK) with the given stride/padding, via Pallas."""
    n, c_in, l_in = x.shape
    c_out, c_in_w, k = weights.shape
    assert c_in == c_in_w
    s = int(stride)
    l_out = (l_in + 2 * padding - k) // s + 1
    assert l_out > 0

    k_eff = pl.cdiv(k, s)          # taps after polyphase decomposition
    c_eff = c_in * s               # channels after polyphase decomposition
    assert k_eff <= _HALO, "kernel_size too large for the fixed 128-sample halo"

    l_tile = min(max_l_tile, _round_up(l_out, 128))
    n_l_tiles = pl.cdiv(l_out, l_tile)
    l_out_pad = n_l_tiles * l_tile

    # Single combined pad: conv zero-padding + tile/halo alignment zeros.
    # TODO(synk): fold the edge zero-padding into the kernel (pl.when on edge tiles)
    #             to avoid this extra HBM round-trip on very long inputs.
    target_len = s * (l_out_pad + _HALO)          # in the original sample domain
    right_pad = target_len - l_in - padding
    assert right_pad >= padding
    x_p = jnp.pad(x, ((0, 0), (0, 0), (padding, right_pad)))

    if s > 1:
        # Polyphase: stride-s conv  ->  stride-1 conv over C_in*s channels, K' taps.
        m = target_len // s
        x_eff = x_p.reshape(n, c_in, m, s).transpose(0, 1, 3, 2).reshape(n, c_eff, m)
        w_pad = jnp.pad(weights, ((0, 0), (0, 0), (0, k_eff * s - k)))
        w_eff = w_pad.reshape(c_out, c_in, k_eff, s).transpose(0, 1, 3, 2)
        w_eff = w_eff.reshape(c_out, c_eff, k_eff)
    else:
        x_eff = x_p
        w_eff = weights

    # Flatten weights to (C_out, K'*C) with row-major (tap, channel) order; this
    # matches the in-kernel patch layout and keeps K off the lane dim of any slice.
    w_flat = jnp.transpose(w_eff, (0, 2, 1)).reshape(c_out, k_eff * c_eff)

    y = _conv1d_stride1_pallas(x_eff, w_flat, k_taps=k_eff, l_tile=l_tile,
                               n_l_tiles=n_l_tiles, out_dtype=x.dtype)
    return y[:, :, :l_out]


# ----------------------------------------------------------------------------
# Demo / correctness check
# ----------------------------------------------------------------------------
if __name__ == "__main__":
    key = jax.random.PRNGKey(0)
    k_f, k_x, k_f2, k_x2 = jax.random.split(key, 4)

    # ---- config 1: module defaults (stride=1, Hilbert pairs), small shapes ----
    in_channels, out_channels = 4, 6
    use_hilbert = True
    n_filters = in_channels * out_channels
    assert n_filters % 2 == 0
    n_latent = n_filters // 2 if use_hilbert else n_filters

    sample_rate = 16000                      # recorded by prepare(); not used in the math
    kernel_size, stride = 9, 1
    padding = (kernel_size - stride) // 2    # default padding in prepare()

    # TODO(synk): real ContFilterType sampling; deterministic synthetic filters here.
    filters = jax.random.normal(k_f, (n_latent, kernel_size), dtype=jnp.float32)
    weights = fir_weights(filters, in_channels, out_channels, use_hilbert)

    batch, length = 2, 16
    x = jax.random.normal(k_x, (batch, in_channels, length), dtype=jnp.float32)

    y = jax.block_until_ready(sfi_conv1d(x, weights, stride=stride, padding=padding))
    y_ref = jax.lax.conv_general_dilated(
        x, weights, window_strides=(stride,), padding=[(padding, padding)],
        dimension_numbers=("NCH", "OIH", "NCH"),
        precision=jax.lax.Precision.HIGHEST)
    assert y.shape == y_ref.shape
    assert jnp.allclose(y, y_ref, atol=1e-3, rtol=1e-3)

    # ---- config 2: stride=2 (polyphase path), multiple L tiles, no Hilbert ----
    kernel_size2, stride2 = 9, 2
    padding2 = (kernel_size2 - stride2) // 2
    filters2 = jax.random.normal(k_f2, (in_channels * out_channels, kernel_size2),
                                 dtype=jnp.float32)
    weights2 = fir_weights(filters2, in_channels, out_channels, False)
    x2 = jax.random.normal(k_x2, (batch, in_channels, 300), dtype=jnp.float32)

    y2 = jax.block_until_ready(
        sfi_conv1d(x2, weights2, stride=stride2, padding=padding2, max_l_tile=128))
    y2_ref = jax.lax.conv_general_dilated(
        x2, weights2, window_strides=(stride2,), padding=[(padding2, padding2)],
        dimension_numbers=("NCH", "OIH", "NCH"),
        precision=jax.lax.Precision.HIGHEST)
    assert y2.shape == y2_ref.shape
    assert jnp.allclose(y2, y2_ref, atol=1e-3, rtol=1e-3)

    print("KERNEL_OK")
</pallas_src>

<mosaic_0001>
module attributes {stable_mosaic.version = 11 : i64} {
  func.func @_fir_conv1d_s1_kernel(%arg0: i32, %arg1: i32, %arg2: memref<1x4x128xf32, #tpu.memory_space<vmem>>, %arg3: memref<1x4x128xf32, #tpu.memory_space<vmem>>, %arg4: memref<6x36xf32, #tpu.memory_space<vmem>>, %arg5: memref<1x6x128xf32, #tpu.memory_space<vmem>>) attributes {dimension_semantics = [#tpu.dimension_semantics<parallel>, #tpu.dimension_semantics<parallel>], iteration_bounds = array<i64: 2, 1>, scalar_prefetch = 0 : i64, scratch_operands = 0 : i64, tpu.core_type = #tpu.core_type<tc>, window_params = [{transform_indices = @transform_0, window_bounds = array<i64: 1, 4, 128>}, {transform_indices = @transform_1, window_bounds = array<i64: 1, 4, 128>}, {pipeline_mode = #tpu.pipeline_mode<synchronous>, transform_indices = @transform_2, window_bounds = array<i64: 6, 36>}, {transform_indices = @transform_3, window_bounds = array<i64: 1, 6, 128>}]} {
    %c0 = arith.constant 0 : index
    %c0_0 = arith.constant 0 : index
    %c0_1 = arith.constant 0 : index
    %0 = vector.load %arg2[%c0, %c0_0, %c0_1] : memref<1x4x128xf32, #tpu.memory_space<vmem>>, vector<1x4x128xf32>
    %1 = vector.shape_cast %0 : vector<1x4x128xf32> to vector<4x128xf32>
    %c0_2 = arith.constant 0 : index
    %c0_3 = arith.constant 0 : index
    %c0_4 = arith.constant 0 : index
    %2 = vector.load %arg3[%c0_2, %c0_3, %c0_4] : memref<1x4x128xf32, #tpu.memory_space<vmem>>, vector<1x4x128xf32>
    %3 = vector.shape_cast %2 : vector<1x4x128xf32> to vector<4x128xf32>
    %4 = tpu.concatenate %1, %3 in 1 : vector<4x128xf32>, vector<4x128xf32> -> vector<4x256xf32>
    %5 = vector.extract_strided_slice %4 {offsets = [0, 0], sizes = [4, 128], strides = [1, 1]} : vector<4x256xf32> to vector<4x128xf32>
    %6 = vector.extract_strided_slice %4 {offsets = [0, 1], sizes = [4, 128], strides = [1, 1]} : vector<4x256xf32> to vector<4x128xf32>
    %7 = vector.extract_strided_slice %4 {offsets = [0, 2], sizes = [4, 128], strides = [1, 1]} : vector<4x256xf32> to vector<4x128xf32>
    %8 = vector.extract_strided_slice %4 {offsets = [0, 3], sizes = [4, 128], strides = [1, 1]} : vector<4x256xf32> to vector<4x128xf32>
    %9 = vector.extract_strided_slice %4 {offsets = [0, 4], sizes = [4, 128], strides = [1, 1]} : vector<4x256xf32> to vector<4x128xf32>
    %10 = vector.extract_strided_slice %4 {offsets = [0, 5], sizes = [4, 128], strides = [1, 1]} : vector<4x256xf32> to vector<4x128xf32>
    %11 = vector.extract_strided_slice %4 {offsets = [0, 6], sizes = [4, 128], strides = [1, 1]} : vector<4x256xf32> to vector<4x128xf32>
    %12 = vector.extract_strided_slice %4 {offsets = [0, 7], sizes = [4, 128], strides = [1, 1]} : vector<4x256xf32> to vector<4x128xf32>
    %13 = vector.extract_strided_slice %4 {offsets = [0, 8], sizes = [4, 128], strides = [1, 1]} : vector<4x256xf32> to vector<4x128xf32>
    %14 = tpu.concatenate %5, %6, %7, %8, %9, %10, %11, %12, %13 in 0 : vector<4x128xf32>, vector<4x128xf32>, vector<4x128xf32>, vector<4x128xf32>, vector<4x128xf32>, vector<4x128xf32>, vector<4x128xf32>, vector<4x128xf32>, vector<4x128xf32> -> vector<36x128xf32>
    %c0_5 = arith.constant 0 : index
    %c0_6 = arith.constant 0 : index
    %15 = vector.load %arg4[%c0_5, %c0_6] : memref<6x36xf32, #tpu.memory_space<vmem>>, vector<6x36xf32>
    %cst = arith.constant dense<0.000000e+00> : vector<6x128xf32>
    %16 = tpu.matmul %15, %14, %cst {dimension_numbers = #tpu.dot_dimension_numbers<[1], [0], [0], [1], [0, 0, 1, 1], [], []>} : vector<6x36xf32>, vector<36x128xf32>, vector<6x128xf32> -> vector<6x128xf32>
    %c0_7 = arith.constant 0 : index
    %c0_8 = arith.constant 0 : index
    %c0_9 = arith.constant 0 : index
    %17 = vector.load %arg5[%c0_7, %c0_8, %c0_9] : memref<1x6x128xf32, #tpu.memory_space<vmem>>, vector<1x6x128xf32>
    %18 = vector.shape_cast %17 : vector<1x6x128xf32> to vector<6x128xf32>
    %19 = vector.shape_cast %16 : vector<6x128xf32> to vector<1x6x128xf32>
    tpu.vector_store %arg5[%c0_7, %c0_8, %c0_9], %19 {strides = array<i32>} : memref<1x6x128xf32, #tpu.memory_space<vmem>>, vector<1x6x128xf32>,
    return
  }
  func.func @transform_0(%arg0: i32, %arg1: i32) -> (i32, i32, i32) {
    %c0_i32 = arith.constant 0 : i32
    %c0_i32_0 = arith.constant 0 : i32
    return %arg0, %c0_i32, %arg1 : i32, i32, i32
  }
  func.func @transform_1(%arg0: i32, %arg1: i32) -> (i32, i32, i32) {
    %c1_i32 = arith.constant 1 : i32
    %0 = arith.addi %arg1, %c1_i32 : i32
    %c1_i32_0 = arith.constant 1 : i32
    %1 = arith.muli %0, %c1_i32_0 : i32
    %c0_i32 = arith.constant 0 : i32
    %c0_i32_1 = arith.constant 0 : i32
    return %arg0, %c0_i32, %1 : i32, i32, i32
  }
  func.func @transform_2(%arg0: i32, %arg1: i32) -> (i32, i32) {
    %c0_i32 = arith.constant 0 : i32
    %c0_i32_0 = arith.constant 0 : i32
    %c0_i32_1 = arith.constant 0 : i32
    return %c0_i32, %c0_i32_0 : i32, i32
  }
  func.func @transform_3(%arg0: i32, %arg1: i32) -> (i32, i32, i32) {
    %c0_i32 = arith.constant 0 : i32
    %c0_i32_0 = arith.constant 0 : i32
    return %arg0, %c0_i32, %arg1 : i32, i32, i32
  }
}

</mosaic_0001>

<bundles_post_ra>
// kernel: tpu_custom_call.1
= control target key start
LH: loop header
LB: loop body
LE: loop exit
PB: predicated region body
PF: predicated region fallthrough
CT: control target
= control target key end

     0   :  { %s938_s0 = inlined_call_operand.hbm [shape: f32[2,4,256], index: 0, kind: input, shape index: {}]   ;;  %s939_s1 = inlined_call_operand.hbm [shape: f32[2,4,256], index: 1, kind: input, shape index: {}]   ;;  %s940_s2 = inlined_call_operand.hbm [shape: f32[6,36], index: 2, kind: input, shape index: {}]   ;;  %s941_s3 = inlined_call_operand.vmem [shape: f32[2,6,128], index: 3, kind: output, shape index: {}]  }
   0x1   :  { %943 = sst [smem:[#allocation10_spill]] %s940_s2 }
   0x2   :  { %8 = vsyncpa [#allocation3], 0 }
   0x3   :  { %10 = vsyncpa [#allocation3 + $0x1], 0 }
   0x4   :  { %11 = vsyncpa [#allocation5], 0 }
   0x5   :  { %13 = vsyncpa [#allocation5 + $0x1], 0  ;;  %s802_s12 = smov 0   ;;  %s804_s13 = smov 0  }
   0x6   :  { %s806_s14 = smov 0   ;;  %s808_s15 = smov 0  }
   0x7   :  { %s810_s16 = smov 0   ;;  %s812_s17 = smov 0  }
   0x8 LB: > { %s942_s18 = sadd.s32 4294967295, %s771_s17   ;;  %p53_p0 = scmp.ne.s32.totalorder %s755_s13, %s751_s12  ;;  %s771_s17 = sphi %s812_s17, %s19_s17   ;;  %s767_s16 = sphi %s810_s16, %s954_s16   ;;  %s763_s15 = sphi %s808_s15, %s953_s15   ;;  %s759_s14 = sphi %s806_s14, %s952_s14   ;;  %s755_s13 = sphi %s804_s13, %s951_s13   ;;  %s751_s12 = sphi %s802_s12, %s950_s12  }
   0x9   : > { %p834_p1 = scmp.eq.s32.totalorder %s942_s18, 0  ;;  %p489_p2 = scmp.ge.s32.totalorder %s771_s17, 1 }
   0xa   : > { %p143_p3 = scmp.lt.s32.totalorder %s771_s17, 3  ;;  %s946_s2 = sld [smem:[#allocation10_spill]] }
   0xb   : > { %p842_p4 = por %p834_p1, %p53_p0  ;;  %s773_s25 = smov [#allocation6]  }
   0xc   : > { %p849_p5 = pnand %p489_p2, %p143_p3  ;;  %s157_s26 = sshll.u32 %s773_s25, 4  ;;  %s158_s26 = int_to_ptr.vmem [resolvable:$true] %s157_s26 }
   0xd   : > { %s31_s27 = sadd.s32 1, %s767_s16  ;;  %s40_s28 = sadd.s32 1, %s759_s14 }
   0xe   : > { %p517_p6 = pneg %p849_p5  ;;  %p33_p8 = scmp.ge.s32.totalorder %s31_s27, 2 }
   0xf   : > { %p47_p9 = scmp.ne.s32.totalorder %s759_s14, %s755_s13  ;;  %p48_p10 = scmp.eq.s32.totalorder %s771_s17, 0 }
  0x10   : > { %s155_s23 = sshll.u32 %s946_s2, 4  ;;  %p518_p7 = pnand %p517_p6, %p834_p1  ;;  %s156_s23 = int_to_ptr.hbm [resolvable:$true] %s155_s23 }
  0x11   : > { %s956_s27 = smov (%p33_p8, %s31_s27), 0  ;;  %p864_p11 = por %p48_p10, %p47_p9 }
  0x12   : > { %520 = dma.hbm_to_vmem [thread:$0]  (!%p518_p7), %s156_s23, 128, %s158_s26, [#allocation5]  }
  0x13   : > { %p529_p12 = scmp.lt.s32.totalorder %s771_s17, 2  ;;  %s35_s30 = ssub.s32 %s767_s16, %s956_s27 }
  0x14   : > { %s168_s4 = sand.u32 1, %s759_s14   ;;  %p38_p13 = scmp.eq.s32.totalorder %s35_s30, 0 }
  0x15   : > { %s492_s5 = sshll.u32 %s168_s4, 2  ;;  %s507_s6 = sshll.u32 %s767_s16, 3 }
  0x16   : > { %s874_s7 = scalar_select %p38_p13, %s759_s14, %s40_s28  }
  0x17   : > { %s178_s10 = scalar_lea.hbm %s938_s0, %s507_s6  ;;  %s172_s12 = scalar_lea.vmem [#allocation2], %s492_s5 }
  0x18   : > { %s180_s11 = sshll.u32 %s178_s10, 4  ;;  %s182_s21 = sshll.u32 %s172_s12, 4  ;;  %s181_s11 = int_to_ptr.hbm [resolvable:$true] %s180_s11  ;;  %s183_s21 = int_to_ptr.vmem [resolvable:$true] %s182_s21 }
  0x19   : > { %p522_p0 = pnand %p529_p12, %p864_p11  ;;  %s411_s25 = scalar_lea.hbm %s939_s1, %s507_s6 }
  0x1a   : > { %s189_s26 = sand.u32 1, %s771_s17   ;;  %s169_s30 = scalar_lea.sflag [#allocation3], %s168_s4 }
  0x1b   : > { %524 = dma.hbm_to_vmem [thread:$0]  (!%p522_p0), %s181_s11, 64, %s183_s21, %s169_s30  }
  0x1c   : > { %s412_s28 = scalar_lea.hbm %s411_s25, 4  ;;  %s193_s18 = scalar_lea.vmem [#allocation4], %s492_s5 }
  0x1d   : > { %s204_s2 = sshll.u32 %s193_s18, 4  ;;  %s202_s8 = sshll.u32 %s412_s28, 4  ;;  %s205_s2 = int_to_ptr.vmem [resolvable:$true] %s204_s2  ;;  %s203_s8 = int_to_ptr.hbm [resolvable:$true] %s202_s8 }
  0x1e   : > { %s190_s9 = scalar_lea.sflag [#allocation5], %s189_s26  ;;  %213 = sbr.rel (%p849_p5) target bundleno = 310 (0x136), region = 32 }
  0x1f   : > { %527 = dma.hbm_to_vmem [thread:$0]  (!%p522_p0), %s203_s8, 64, %s205_s2, %s190_s9  }
  0x20   : > { %s215_s29 = sand.u32 (!%p849_p5), 1, %s755_s13  }
  0x21   : > { %s499_s10 = sshll.u32 (!%p849_p5), %s215_s29, 2  ;;  %s216_s12 = scalar_lea.sflag (!%p849_p5), [#allocation3], %s215_s29 }
  0x22   : > { %s219_s6 = scalar_lea.vmem (!%p849_p5), [#allocation2], %s499_s10 }
  0x23   : > { %738 = dma.done.wait (%p842_p4), %s216_s12, 64  }
  0x24   : > { %740 = vsyncadd (%p842_p4), %s216_s12, 4294967232  ;;  %s949_s18 = sadd.s32 4294967295, %s771_s17   ;;  %s229_s2 = scalar_lea.vmem [#allocation4], %s499_s10 }
  0x25   : > { %s225_s4 = sand.u32 1, %s949_s18  }
  0x26   : > { %s226_s5 = scalar_lea.sflag [#allocation5], %s225_s4 }
  0x27   : > { %742 = dma.done.wait (%p842_p4), %s226_s5, 64  }
  0x28   : > { %744 = vsyncadd (%p842_p4), %s226_s5, 4294967232 }
  0x29   : > { %746 = dma.done.wait (%p834_p1), [#allocation5], 128  }
  0x2a   : > { %748 = vsyncadd (%p834_p1), [#allocation5], 4294967168  ;;  %v904_v0 = vld [vmem:[%s219_s6] sm:$0xf]  ;;  %v274_v1 = vld [vmem:[%s229_s2] sm:$0xf] }
  0x2b   : > { %s774_s24 = smov 120   ;;  %v588_v2 = vpack.i.bf16 %v274_v1, %v904_v0  ;;  %s775_s11 = smov 122   ;;  %v277_v3 = vrot.slane %v904_v0, 4  ;;  %v278_v4 = vrot.slane %v274_v1, 4  ;;  %vm332_vm0 = vcmask 982016  }
  0x2c   : > { %328 = vrot.lane.b32.xlu0 %v904_v0, %s774_s24  ;;  %s776_s20 = smov 124   ;;  %s777_s21 = smov 121   ;;  %vm334_vm1 = vcmask 1043456   ;;  %vm318_vm2 = vcmask 998400   ;;  %vm325_vm3 = vcmask 990208   ;;  %vm304_vm4 = vcmask 1014784  }
  0x2d   : > { %589 = vrot.lane.b32.xlu1 %v588_v2, %s775_s11  ;;  %594 = vrot.lane.b32.xlu2 %v588_v2, %s776_s20  ;;  %v598_v5 = vpack.i.bf16 %v278_v4, %v277_v3  ;;  %s778_s19 = smov 123   ;;  %s779_s22 = smov 126   ;;  %vm311_vm5 = vcmask 1006592   ;;  %vm290_vm6 = vcmask 1031168   ;;  %vm283_vm7 = vcmask 1039360  }
  0x2e   : > { %s780_s23 = smov 125   ;;  %s781_s25 = smov 127   ;;  %vm297_vm8 = vcmask 1022976   ;;  %v339_v41 = vld [vmem:[#allocation6] sm:$0x3f]  ;;  %vm340_vm9 = vcmask 293888  }
  0x2f   : > { %p266_p1 = scmp.lt.s32.totalorder %s763_s15, 1 }
  0x31   : > { %s958_s15 = smov (!%p266_p1, %s763_s15), 1 }
  0x32   : > { %s502_s26 = sshll.u32 %s958_s15, 3 }
  0x33   : > { %s272_s8 = scalar_lea.vmem %s941_s3, %s502_s26 }
  0x34   : > { %330 = vrot.lane.b32.xlu0 %v274_v1, %s774_s24 }
  0x35   : > { %599 = vrot.lane.b32.xlu1 %v598_v5, %s777_s21  ;;  %604 = vrot.lane.b32.xlu2 %v598_v5, %s778_s19 }
  0x3c   : > { %609 = vrot.lane.b32.xlu0 %v588_v2, %s779_s22 }
  0x3d   : > { %614 = vrot.lane.b32.xlu1 %v598_v5, %s780_s23  ;;  %619 = vrot.lane.b32.xlu2 %v598_v5, %s781_s25 }
  0x87   : > { %v595_v6 = vpop.permute.xlu2 %594 }
  0x88   : > { %v597_v10 = vunpack.i.h.bf16 %v595_v6  ;;  %v596_v11 = vunpack.i.l.bf16 %v595_v6 }
  0x8a   : > { %v305_v24 = vsel %vm304_vm4, %v596_v11, %v597_v10 }
  0x8f   : > { %v605_v9 = vpop.permute.xlu2 %604 }
  0x90   : > { %v607_v12 = vunpack.i.h.bf16 %v605_v9  ;;  %v606_v16 = vunpack.i.l.bf16 %v605_v9 }
  0x92   : > { %v312_v25 = vsel %vm311_vm5, %v606_v16, %v607_v12 }
  0x93   : > { %v337_v29 = vsel %vm334_vm1, %v305_v24, %v312_v25 }
  0x97   : > { %v620_v21 = vpop.permute.xlu2 %619 }
  0x98   : > { %v622_v27 = vunpack.i.h.bf16 %v620_v21  ;;  %v621_v28 = vunpack.i.l.bf16 %v620_v21 }
  0x9a   : > { %v284_v37 = vsel %vm283_vm7, %v621_v28, %v622_v27 }
  0x9b   : > { %v335_v40 = vsel %vm334_vm1, %v904_v0, %v284_v37 }
  0x9e   : > { %v329_v7 = vpop.permute.xlu0 %328 }
  0x9f   : > { %v590_v8 = vpop.permute.xlu1 %589 }
  0xa0   : > { %v592_v14 = vunpack.i.h.bf16 %v590_v8  ;;  %v591_v15 = vunpack.i.l.bf16 %v590_v8 }
  0xa2   : > { %v319_v22 = vsel %vm318_vm2, %v591_v15, %v592_v14 }
  0xa6   : > { %v331_v13 = vpop.permute.xlu0 %330 }
  0xa7   : > { %v333_v17 = vsel %vm332_vm0, %v329_v7, %v331_v13  ;;  %v600_v18 = vpop.permute.xlu1 %599 }
  0xa8   : > { %503 = vmatpush.msk.msra.mxu0 %vm334_vm1, %v333_v17  ;;  %v602_v19 = vunpack.i.h.bf16 %v600_v18  ;;  %v601_v20 = vunpack.i.l.bf16 %v600_v18 }
  0xaa   : > { %v326_v23 = vsel %vm325_vm3, %v601_v20, %v602_v19 }
  0xab   : > { %v338_v26 = vsel %vm334_vm1, %v319_v22, %v326_v23 }
  0xac   : > { %358 = vmatpush.msra.mxu0 %v338_v26 }
  0xae   : > { %v610_v30 = vpop.permute.xlu0 %609  ;;  %359 = vmatpush.msra.mxu0 %v337_v29 }
  0xaf   : > { %v612_v31 = vunpack.i.h.bf16 %v610_v30  ;;  %v611_v32 = vunpack.i.l.bf16 %v610_v30  ;;  %v615_v33 = vpop.permute.xlu1 %614 }
  0xb0   : > { %v617_v34 = vunpack.i.h.bf16 %v615_v33  ;;  %v616_v35 = vunpack.i.l.bf16 %v615_v33 }
  0xb1   : > { %v291_v36 = vsel %vm290_vm6, %v611_v32, %v612_v31 }
  0xb2   : > { %v298_v38 = vsel %vm297_vm8, %v616_v35, %v617_v34 }
  0xb3   : > { %v336_v39 = vsel %vm334_vm1, %v291_v36, %v298_v38 }
  0xb4   : > { %360 = vmatpush.msra.mxu0 %v336_v39 }
  0xb6   : > { %361 = vmatpush.msra.mxu0 %v335_v40 }
  0xb7   : > { %504 = vmatmul.msk.f32.vlgmr.msra.gmra.mxu0 %vm340_vm9, %v339_v41 }
 0x134   : > { %v363_v42 = vpop.f32.mrf.mxu0 }
 0x135   : > { %366 = vst [vmem:[%s272_s8] sm:$0x3f] %v363_v42 }
 0x136 PF: > { %s19_s17 = sadd.s32 1, %s771_s17   ;;  %s950_s12 = smov %s755_s13 }
 0x137   : > { %p16_p2 = scmp.ge.s32.totalorder %s19_s17, 4   ;;  %s951_s13 = smov %s759_s14 }
 0x138   : > { %s952_s14 = smov %s874_s7  ;;  %s953_s15 = smov %s767_s16 }
 0x139   : > { %s954_s16 = smov %s956_s27  ;;  %18 = sbr.rel (!%p16_p2) target bundleno = 8 (0x8), region = 89 }
 0x13e   :  { %392 = vsyncpa [#allocation3], 1 }
 0x13f   :  { %394 = vsyncpa [#allocation3 + $0x1], 1 }
 0x140   :  { %395 = vsyncpa [#allocation5], 1 }
 0x141   :  { %397 = vsyncpa [#allocation5 + $0x1], 1 }

</bundles_post_ra>
